<compile_context>
chip_gen: v7x
topology: tpu7x:2x2x1
jax: 0.10.0
libtpu: 0.0.40
codegen_flags: <defaults>
</compile_context>

<pallas_src>
import functools

import jax
import jax.numpy as jnp
from jax.experimental import pallas as pl
from jax.experimental.pallas import tpu as pltpu

LANE = 128
SUBLANE = 8


def _round_up(v, m):
    return ((v + m - 1) // m) * m


def mlp_kernel(x_ref, w1_ref, b1_ref, w2_ref, b2_ref, w3_ref, b3_ref, o_ref):
    # Layer 1: Linear(F -> 128) + ReLU (f32 accumulation, f32 bias/activation path)
    h1 = jnp.dot(x_ref[...], w1_ref[...], preferred_element_type=jnp.float32)
    h1 = jnp.maximum(h1 + b1_ref[...], 0.0)
    # Layer 2: Linear(128 -> 128 [64 real + zero pad]) + ReLU. Padded bias cols are 0,
    # so ReLU(0) = 0 keeps padded columns inert.
    h2 = jnp.dot(h1.astype(w2_ref.dtype), w2_ref[...],
                 preferred_element_type=jnp.float32)
    h2 = jnp.maximum(h2 + b2_ref[...], 0.0)
    # Layer 3: Linear(128 -> 128 [out_classes real + zero pad]), no activation.
    out = jnp.dot(h2.astype(w3_ref.dtype), w3_ref[...],
                  preferred_element_type=jnp.float32)
    o_ref[...] = (out + b3_ref[...]).astype(o_ref.dtype)


def dqn_forward(x, params, *, tile_b=128, compute_dtype=jnp.float32):
    """Forward pass. x: (batch, ...) -- flattened inside (nn.Flatten semantics)."""
    w1, b1, w2, b2, w3, b3 = params
    b = x.shape[0]
    x2d = x.reshape(b, -1)
    f = x2d.shape[1]
    h1 = w1.shape[1]                      # 128
    h2 = w2.shape[1]                      # 64
    out_classes = w3.shape[1]

    # ---- lane-dense padding of hidden2 / output widths (zero columns/rows) ----
    h2p = _round_up(h2, LANE)
    outp = _round_up(out_classes, LANE)
    w2p = jnp.pad(w2, ((0, 0), (0, h2p - h2)))
    b2p = jnp.pad(b2, ((0, 0), (0, h2p - h2)))
    w3p = jnp.pad(w3, ((0, h2p - h2), (0, outp - out_classes)))
    b3p = jnp.pad(b3, ((0, 0), (0, outp - out_classes)))

    # ---- batch tiling: tile_b multiple of 8, batch padded to a multiple of it ----
    tile_b = _round_up(max(SUBLANE, min(tile_b, _round_up(b, SUBLANE))), SUBLANE)
    bp = _round_up(b, tile_b)
    if bp != b:
        x2d = jnp.pad(x2d, ((0, bp - b), (0, 0)))
    num_tiles = bp // tile_b

    # ---- dtype handling: weights/x may be bf16; biases + accumulation stay f32 ----
    xc = x2d.astype(compute_dtype)
    w1c = w1.astype(compute_dtype)
    w2c = w2p.astype(compute_dtype)
    w3c = w3p.astype(compute_dtype)
    b1f = b1.astype(jnp.float32)
    b2f = b2p.astype(jnp.float32)
    b3f = b3p.astype(jnp.float32)

    # ---- VMEM budget (resident weights + double-buffered x/out tiles) ----
    cbytes = jnp.dtype(compute_dtype).itemsize
    resident = (f * h1 + h1 * h2p + h2p * outp) * cbytes + (h1 + h2p + outp) * 4
    per_tile = tile_b * f * cbytes + tile_b * outp * 4
    vmem_bytes = 2 * resident + 4 * per_tile + (2 << 20)
    vmem_bytes = int(min(max(vmem_bytes, 4 << 20), 64 << 20))

    flops = 2 * bp * (f * h1 + h1 * h2p + h2p * outp)
    bytes_accessed = (bp * f * cbytes
                      + (f * h1 + h1 * h2p + h2p * outp) * cbytes
                      + (h1 + h2p + outp) * 4
                      + bp * outp * 4)

    out = pl.pallas_call(
        mlp_kernel,
        out_shape=jax.ShapeDtypeStruct((bp, outp), jnp.float32),
        grid=(num_tiles,),
        in_specs=[
            pl.BlockSpec((tile_b, f), lambda i: (i, 0)),   # x tile (pipelined)
            pl.BlockSpec((f, h1), lambda i: (0, 0)),       # w1 (resident)
            pl.BlockSpec((1, h1), lambda i: (0, 0)),       # b1
            pl.BlockSpec((h1, h2p), lambda i: (0, 0)),     # w2 (padded, resident)
            pl.BlockSpec((1, h2p), lambda i: (0, 0)),      # b2
            pl.BlockSpec((h2p, outp), lambda i: (0, 0)),   # w3 (padded, resident)
            pl.BlockSpec((1, outp), lambda i: (0, 0)),     # b3
        ],
        out_specs=pl.BlockSpec((tile_b, outp), lambda i: (i, 0)),
        compiler_params=pltpu.CompilerParams(
            dimension_semantics=("parallel",),
            vmem_limit_bytes=vmem_bytes,
        ),
        cost_estimate=pl.CostEstimate(
            flops=flops, transcendentals=0, bytes_accessed=bytes_accessed),
    )(xc, w1c, b1f, w2c, b2f, w3c, b3f)

    # Strip batch / lane padding outside the kernel (cheap XLA slice).
    return out[:b, :out_classes]
    # TODO(synk): for huge flattened inputs (F ~ tens of thousands) add a second
    # "arbitrary" grid axis tiling K of layer 1 with a VMEM accumulator.


def init_params(key, in_channels, out_classes):
    """Deterministic init matching PyTorch Linear shapes (stored transposed)."""
    dims = [(in_channels, 128), (128, 64), (64, out_classes)]
    params = []
    for fan_in, fan_out in dims:
        kw, kb, key = jax.random.split(key, 3)
        bound = 1.0 / jnp.sqrt(jnp.float32(fan_in))
        w = jax.random.uniform(kw, (fan_in, fan_out), jnp.float32, -bound, bound)
        b = jax.random.uniform(kb, (1, fan_out), jnp.float32, -bound, bound)
        params += [w, b]
    return tuple(params)


def reference_forward(x, params):
    """Plain-JAX reference for correctness check."""
    b = x.shape[0]
    h = x.reshape(b, -1).astype(jnp.float32)
    w1, b1, w2, b2, w3, b3 = params
    h = jnp.maximum(h @ w1 + b1, 0.0)
    h = jnp.maximum(h @ w2 + b2, 0.0)
    return h @ w3 + b3


if __name__ == "__main__":
    key = jax.random.PRNGKey(0)
    in_channels = 32      # flattened feature size seen by the first Linear
    out_classes = 4       # number of Q-values / actions
    batch = 64            # > tile_b so the batch grid actually pipelines

    kx, kp = jax.random.split(key)
    x = jax.random.normal(kx, (batch, in_channels), dtype=jnp.float32)
    params = init_params(kp, in_channels, out_classes)

    ref = reference_forward(x, params)

    # f32 path: exact-ish parity with the reference.
    out = jax.block_until_ready(dqn_forward(x, params, tile_b=32,
                                            compute_dtype=jnp.float32))
    assert out.shape == (batch, out_classes), out.shape
    assert jnp.allclose(out, ref, atol=1e-5, rtol=1e-5), "f32 mismatch vs reference"

    # bf16 weights/activations path (memory-bound layer-1 optimization): looser tol.
    out_bf16 = jax.block_until_ready(dqn_forward(x, params, tile_b=32,
                                                 compute_dtype=jnp.bfloat16))
    assert out_bf16.shape == (batch, out_classes), out_bf16.shape
    assert jnp.allclose(out_bf16, ref, atol=1e-1, rtol=1e-1), "bf16 mismatch vs reference"

    print("KERNEL_OK")
</pallas_src>

<mosaic_0001>
module attributes {stable_mosaic.version = 11 : i64} {
  func.func @mlp_kernel(%arg0: i32, %arg1: memref<32x32xf32, #tpu.memory_space<vmem>>, %arg2: memref<32x128xf32, #tpu.memory_space<vmem>>, %arg3: memref<1x128xf32, #tpu.memory_space<vmem>>, %arg4: memref<128x128xf32, #tpu.memory_space<vmem>>, %arg5: memref<1x128xf32, #tpu.memory_space<vmem>>, %arg6: memref<128x128xf32, #tpu.memory_space<vmem>>, %arg7: memref<1x128xf32, #tpu.memory_space<vmem>>, %arg8: memref<32x128xf32, #tpu.memory_space<vmem>>) attributes {dimension_semantics = [#tpu.dimension_semantics<parallel>], iteration_bounds = array<i64: 2>, scalar_prefetch = 0 : i64, scratch_operands = 0 : i64, tpu.core_type = #tpu.core_type<tc>, window_params = [{transform_indices = @transform_0, window_bounds = array<i64: 32, 32>}, {pipeline_mode = #tpu.pipeline_mode<synchronous>, transform_indices = @transform_1, window_bounds = array<i64: 32, 128>}, {pipeline_mode = #tpu.pipeline_mode<synchronous>, transform_indices = @transform_2, window_bounds = array<i64: 1, 128>}, {pipeline_mode = #tpu.pipeline_mode<synchronous>, transform_indices = @transform_3, window_bounds = array<i64: 128, 128>}, {pipeline_mode = #tpu.pipeline_mode<synchronous>, transform_indices = @transform_4, window_bounds = array<i64: 1, 128>}, {pipeline_mode = #tpu.pipeline_mode<synchronous>, transform_indices = @transform_5, window_bounds = array<i64: 128, 128>}, {pipeline_mode = #tpu.pipeline_mode<synchronous>, transform_indices = @transform_6, window_bounds = array<i64: 1, 128>}, {transform_indices = @transform_7, window_bounds = array<i64: 32, 128>}]} {
    %c0 = arith.constant 0 : index
    %c0_0 = arith.constant 0 : index
    %0 = vector.load %arg1[%c0, %c0_0] : memref<32x32xf32, #tpu.memory_space<vmem>>, vector<32x32xf32>
    %c0_1 = arith.constant 0 : index
    %c0_2 = arith.constant 0 : index
    %1 = vector.load %arg2[%c0_1, %c0_2] : memref<32x128xf32, #tpu.memory_space<vmem>>, vector<32x128xf32>
    %cst = arith.constant dense<0.000000e+00> : vector<32x128xf32>
    %2 = tpu.matmul %0, %1, %cst {dimension_numbers = #tpu.dot_dimension_numbers<[1], [0], [0], [1], [0, 0, 1, 1], [], []>} : vector<32x32xf32>, vector<32x128xf32>, vector<32x128xf32> -> vector<32x128xf32>
    %c0_3 = arith.constant 0 : index
    %c0_4 = arith.constant 0 : index
    %3 = vector.load %arg3[%c0_3, %c0_4] : memref<1x128xf32, #tpu.memory_space<vmem>>, vector<1x128xf32>
    %4 = vector.broadcast %3 : vector<1x128xf32> to vector<32x128xf32>
    %5 = arith.addf %2, %4 : vector<32x128xf32>
    %cst_5 = arith.constant 0.000000e+00 : f32
    %6 = vector.broadcast %cst_5 : f32 to vector<32x128xf32>
    %7 = arith.maximumf %5, %6 : vector<32x128xf32>
    %c0_6 = arith.constant 0 : index
    %c0_7 = arith.constant 0 : index
    %8 = vector.load %arg4[%c0_6, %c0_7] : memref<128x128xf32, #tpu.memory_space<vmem>>, vector<128x128xf32>
    %cst_8 = arith.constant dense<0.000000e+00> : vector<32x128xf32>
    %9 = tpu.matmul %7, %8, %cst_8 {dimension_numbers = #tpu.dot_dimension_numbers<[1], [0], [0], [1], [0, 0, 1, 1], [], []>} : vector<32x128xf32>, vector<128x128xf32>, vector<32x128xf32> -> vector<32x128xf32>
    %c0_9 = arith.constant 0 : index
    %c0_10 = arith.constant 0 : index
    %10 = vector.load %arg5[%c0_9, %c0_10] : memref<1x128xf32, #tpu.memory_space<vmem>>, vector<1x128xf32>
    %11 = vector.broadcast %10 : vector<1x128xf32> to vector<32x128xf32>
    %12 = arith.addf %9, %11 : vector<32x128xf32>
    %cst_11 = arith.constant 0.000000e+00 : f32
    %13 = vector.broadcast %cst_11 : f32 to vector<32x128xf32>
    %14 = arith.maximumf %12, %13 : vector<32x128xf32>
    %c0_12 = arith.constant 0 : index
    %c0_13 = arith.constant 0 : index
    %15 = vector.load %arg6[%c0_12, %c0_13] : memref<128x128xf32, #tpu.memory_space<vmem>>, vector<128x128xf32>
    %cst_14 = arith.constant dense<0.000000e+00> : vector<32x128xf32>
    %16 = tpu.matmul %14, %15, %cst_14 {dimension_numbers = #tpu.dot_dimension_numbers<[1], [0], [0], [1], [0, 0, 1, 1], [], []>} : vector<32x128xf32>, vector<128x128xf32>, vector<32x128xf32> -> vector<32x128xf32>
    %c0_15 = arith.constant 0 : index
    %c0_16 = arith.constant 0 : index
    %17 = vector.load %arg7[%c0_15, %c0_16] : memref<1x128xf32, #tpu.memory_space<vmem>>, vector<1x128xf32>
    %18 = vector.broadcast %17 : vector<1x128xf32> to vector<32x128xf32>
    %19 = arith.addf %16, %18 : vector<32x128xf32>
    %c0_17 = arith.constant 0 : index
    %c0_18 = arith.constant 0 : index
    %20 = vector.load %arg8[%c0_17, %c0_18] : memref<32x128xf32, #tpu.memory_space<vmem>>, vector<32x128xf32>
    tpu.vector_store %arg8[%c0_17, %c0_18], %19 {strides = array<i32>} : memref<32x128xf32, #tpu.memory_space<vmem>>, vector<32x128xf32>,
    return
  }
  func.func @transform_0(%arg0: i32) -> (i32, i32) {
    %c0_i32 = arith.constant 0 : i32
    %c0_i32_0 = arith.constant 0 : i32
    return %arg0, %c0_i32 : i32, i32
  }
  func.func @transform_1(%arg0: i32) -> (i32, i32) {
    %c0_i32 = arith.constant 0 : i32
    %c0_i32_0 = arith.constant 0 : i32
    %c0_i32_1 = arith.constant 0 : i32
    return %c0_i32, %c0_i32_0 : i32, i32
  }
  func.func @transform_2(%arg0: i32) -> (i32, i32) {
    %c0_i32 = arith.constant 0 : i32
    %c0_i32_0 = arith.constant 0 : i32
    %c0_i32_1 = arith.constant 0 : i32
    return %c0_i32, %c0_i32_0 : i32, i32
  }
  func.func @transform_3(%arg0: i32) -> (i32, i32) {
    %c0_i32 = arith.constant 0 : i32
    %c0_i32_0 = arith.constant 0 : i32
    %c0_i32_1 = arith.constant 0 : i32
    return %c0_i32, %c0_i32_0 : i32, i32
  }
  func.func @transform_4(%arg0: i32) -> (i32, i32) {
    %c0_i32 = arith.constant 0 : i32
    %c0_i32_0 = arith.constant 0 : i32
    %c0_i32_1 = arith.constant 0 : i32
    return %c0_i32, %c0_i32_0 : i32, i32
  }
  func.func @transform_5(%arg0: i32) -> (i32, i32) {
    %c0_i32 = arith.constant 0 : i32
    %c0_i32_0 = arith.constant 0 : i32
    %c0_i32_1 = arith.constant 0 : i32
    return %c0_i32, %c0_i32_0 : i32, i32
  }
  func.func @transform_6(%arg0: i32) -> (i32, i32) {
    %c0_i32 = arith.constant 0 : i32
    %c0_i32_0 = arith.constant 0 : i32
    %c0_i32_1 = arith.constant 0 : i32
    return %c0_i32, %c0_i32_0 : i32, i32
  }
  func.func @transform_7(%arg0: i32) -> (i32, i32) {
    %c0_i32 = arith.constant 0 : i32
    %c0_i32_0 = arith.constant 0 : i32
    return %arg0, %c0_i32 : i32, i32
  }
}

</mosaic_0001>

<bundles_post_ra>
// kernel: tpu_custom_call.1
= control target key start
LH: loop header
LB: loop body
LE: loop exit
PB: predicated region body
PF: predicated region fallthrough
CT: control target
= control target key end

     0   :  { %12 = vsyncpa [#allocation3], 0  ;;  %s1427_s0 = inlined_call_operand.vmem [shape: f32[64,32], index: 0, kind: input, shape index: {}]   ;;  %s1428_s1 = inlined_call_operand.vmem [shape: f32[32,128], index: 1, kind: input, shape index: {}]   ;;  %s1429_s2 = inlined_call_operand.vmem [shape: f32[1,128], index: 2, kind: input, shape index: {}]   ;;  %s1430_s3 = inlined_call_operand.hbm [shape: f32[128,128], index: 3, kind: input, shape index: {}]   ;;  %s1431_s4 = inlined_call_operand.vmem [shape: f32[1,128], index: 4, kind: input, shape index: {}]   ;;  %s1432_s5 = inlined_call_operand.hbm [shape: f32[128,128], index: 5, kind: input, shape index: {}]   ;;  %s1433_s6 = inlined_call_operand.vmem [shape: f32[1,128], index: 6, kind: input, shape index: {}]   ;;  %s1434_s7 = inlined_call_operand.hbm [shape: f32[64,128], index: 7, kind: output, shape index: {}]  }
   0x1   :  { %13 = vsyncpa [#allocation6], 0 }
   0x2   :  { %14 = vsyncpa [#allocation4], 0 }
   0x3   :  { %16 = vsyncpa [#allocation4 + $0x1], 0  ;;  %s1222_s24 = smov 0   ;;  %s1224_s25 = smov 0  }
   0x4   :  { %s1226_s26 = smov 0   ;;  %s1228_s27 = smov 0  }
   0x5 LB: > { %s1243_s28 = sadd.s32 4294967295, %s1173_s27   ;;  %s749_s29 = sadd.s32 4294967294, %s1173_s27   ;;  %s1173_s27 = sphi %s1228_s27, %s1454_s27   ;;  %s1169_s26 = sphi %s1226_s26, %s1453_s26   ;;  %s1165_s25 = sphi %s1224_s25, %s1452_s25   ;;  %s1161_s24 = sphi %s1222_s24, %s1451_s24  }
   0x6   : > { %s1247_s30 = sadd.s32 1, %s1173_s27   ;;  %s181_s8 = sadd.s32 1, %s1169_s26 }
   0x7   : > { %s178_s9 = ssub.s32 %s1173_s27, %s1247_s30  ;;  %p191_p0 = scmp.ne.s32.totalorder %s1169_s26, %s1165_s25 }
   0x8   : > { %p179_p1 = scmp.eq.s32.totalorder %s178_s9, 0  ;;  %p192_p2 = scmp.eq.s32.totalorder %s1243_s28, 1 }
   0x9   : > { %p197_p3 = scmp.ne.s32.totalorder %s1165_s25, %s1161_s24  ;;  %p198_p4 = scmp.eq.s32.totalorder %s749_s29, 1 }
   0xa   : > { %s1258_s10 = scalar_select %p179_p1, %s1169_s26, %s181_s8  }
   0xb   : > { %p1260_p5 = por %p192_p2, %p191_p0  ;;  %p1264_p6 = por %p198_p4, %p197_p3 }
   0xc   : > { %1438 = sst [smem:[#allocation11_spill]] %s1258_s10  ;;  %p750_p7 = scmp.ge.s32.totalorder %s1173_s27, 1 }
   0xd   : > { %s1439_s11 = scalar_select %p1260_p5, 1, 0 }
   0xe   : > { %s1440_s12 = scalar_select %p1264_p6, 1, 0 }
   0xf   : > { %p205_p8 = scmp.lt.s32.totalorder %s1173_s27, 3  ;;  %p1435_p9 = scmp.eq.s32.totalorder %s1243_s28, 0 }
  0x10   : > { %s1175_s14 = smov [#allocation2]   ;;  %s1176_s17 = smov [#allocation5]  }
  0x11   : > { %p1271_p10 = pnand %p750_p7, %p205_p8  ;;  %s223_s15 = sshll.u32 %s1175_s14, 4  ;;  %s224_s15 = int_to_ptr.vmem [resolvable:$true] %s223_s15 }
  0x12   : > { %s239_s18 = sshll.u32 %s1176_s17, 4  ;;  %s1047_s21 = scalar_lea.hbm %s1430_s3, 2048  ;;  %s1283_s18 = int_to_ptr.vmem [resolvable:$true] %s239_s18 }
  0x13   : > { %s1441_s13 = scalar_select %p1271_p10, 1, 0 }
  0x14   : > { %p993_p11 = pneg %p1271_p10  ;;  %p1048_p13 = scmp.ne.s32.totalorder %s1430_s3, %s1047_s21 }
  0x15   : > { %p1054_p3 = scmp.lt.u32.totalorder %s1047_s21, %s1430_s3 }
  0x16   : > { %p1279_p12 = pnand %p1435_p9, %p993_p11 }
  0x18   : > { %p1049_p0 = pneg %p1279_p12 }
  0x1a   : > { %p1050_p1 = pnand %p1049_p0, %p1048_p13 }
  0x1c   : > { %p1051_p2 = pneg %p1050_p1 }
  0x1e   : > { %p1056_p4 = pnand %p1054_p3, %p1051_p2 }
  0x20   : > { %1059 = shalt.err (!%p1056_p4)
}
  0x21   : > { %s1060_s9 = scalar_lea.vmem %s224_s15, 2048  ;;  %p1068_p9 = scmp.lt.s32.totalorder %s224_s15, %s224_s15 }
  0x22   : > { %p1061_p7 = scmp.ne.s32.totalorder %s224_s15, %s1060_s9  ;;  %p1069_p6 = scmp.lt.s32.totalorder %s1060_s9, %s1060_s9 }
  0x24   : > { %p1063_p8 = pnand %p1061_p7, %p1049_p0  ;;  %p1070_p5 = por %p1069_p6, %p1068_p9 }
  0x26   : > { %p1064_p11 = pneg %p1063_p8 }
  0x28   : > { %p1071_p10 = pnand %p1070_p5, %p1064_p11 }
  0x2a   : > { %1074 = shalt.err (!%p1071_p10)
}
  0x2b   : > { %s1177_s14 = smov 128   ;;  %s1178_s17 = smov 8  }
  0x2c   : > { %996 = dma.hbm_to_vmem [thread:$0]  (!%p1279_p12), %s1430_s3, 2048, %s224_s15, [#allocation3], %s1177_s14, %s1177_s14, %s1178_s17  }
  0x2d   : > { %s1075_s23 = scalar_lea.hbm %s1432_s5, 2048 }
  0x2e   : > { %p1076_p13 = scmp.ne.s32.totalorder %s1432_s5, %s1075_s23  ;;  %p1082_p9 = scmp.lt.u32.totalorder %s1075_s23, %s1432_s5 }
  0x30   : > { %p1078_p5 = pnand %p1076_p13, %p1049_p0 }
  0x32   : > { %p1079_p6 = pneg %p1078_p5 }
  0x34   : > { %p1084_p10 = pnand %p1082_p9, %p1079_p6 }
  0x36   : > { %1087 = shalt.err (!%p1084_p10)
}
  0x37   : > { %s1088_s15 = scalar_lea.vmem %s1283_s18, 2048  ;;  %p1096_p4 = scmp.lt.s32.totalorder %s1283_s18, %s1283_s18 }
  0x38   : > { %p1089_p1 = scmp.ne.s32.totalorder %s1283_s18, %s1088_s15  ;;  %p1097_p7 = scmp.lt.s32.totalorder %s1088_s15, %s1088_s15 }
  0x3a   : > { %p1091_p2 = pnand %p1089_p1, %p1049_p0  ;;  %p1098_p8 = por %p1097_p7, %p1096_p4 }
  0x3c   : > { %p1092_p3 = pneg %p1091_p2 }
  0x3e   : > { %p1099_p11 = pnand %p1098_p8, %p1092_p3 }
  0x40   : > { %1102 = shalt.err (!%p1099_p11)
}
  0x41   : > { %999 = dma.hbm_to_vmem [thread:$0]  (!%p1279_p12), %s1432_s5, 2048, %s1283_s18, [#allocation6], %s1177_s14, %s1177_s14, %s1178_s17  }
  0x42   : > { %p1443_p13 = scmp.ne.s32.totalorder %s1441_s13, 0 }
  0x43   : > { %p1444_p5 = scmp.eq.s32.totalorder (!%p1443_p13), %s1243_s28, 0 }
  0x44   : > { %267 = sbr.rel (%p1443_p13) target bundleno = 761 (0x2f9), region = 48 }
  0x4b   : > { %1148 = dma.done.wait (%p1444_p5), [#allocation3], 2048   ;;  %p1445_p0 = pmov %p1444_p5 }
  0x4d   : > { %1150 = vsyncadd (%p1445_p0), [#allocation3], 4294965248  ;;  %p1446_p6 = pmov %p1445_p0 }
  0x4e   : > { %p1447_p9 = pmov %p1445_p0 }
  0x4f   : > { %1152 = dma.done.wait (%p1446_p6), [#allocation6], 2048  }
  0x50   : > { %1154 = vsyncadd (%p1447_p9), [#allocation6], 4294965248  ;;  %s758_s16 = sshll.u32 %s1243_s28, 2  ;;  %vm325_vm0 = vcmask 261120   ;;  %v314_v0 = vld [vmem:[%s1428_s1] sm:$0xff]  ;;  %v315_v1 = vld [vmem:[%s1428_s1 + $0x8] sm:$0xff] }
  0x51   : > { %p304_p10 = scmp.lt.s32.totalorder %s758_s16, 7  ;;  %v316_v2 = vld [vmem:[%s1428_s1 + $0x10] sm:$0xff]  ;;  %v911_v3 = vpack.c.bf16 %v315_v1, %v314_v0  ;;  %v317_v4 = vld [vmem:[%s1428_s1 + $0x18] sm:$0xff]  ;;  %v427_v7 = vld [vmem:[#allocation2] sm:$0xff]  ;;  %s300_s14 = sand.u32 1, %s1165_s25  }
  0x52   : > { %v915_v6 = vpack.c.bf16 %v317_v4, %v316_v2  ;;  %v428_v8 = vld [vmem:[#allocation2 + $0x8] sm:$0xff]  ;;  %v429_v9 = vld [vmem:[#allocation2 + $0x10] sm:$0xff]  ;;  %v430_v10 = vld [vmem:[#allocation2 + $0x18] sm:$0xff]  ;;  %s757_s13 = sshll.u32 %s300_s14, 5  ;;  %s772_s23 = sshll.u32 %s1243_s28, 9 }
  0x53   : > { %s1456_s16 = smov (!%p304_p10, %s758_s16), 7  ;;  %912 = vmatprep.subr.bf16.mxu0 %v911_v3  ;;  %v919_v11 = vpack.c.bf16 %v428_v8, %v427_v7  ;;  %v923_v12 = vpack.c.bf16 %v430_v10, %v429_v9  ;;  %v431_v13 = vld [vmem:[#allocation2 + $0x20] sm:$0xff]  ;;  %v432_v14 = vld [vmem:[#allocation2 + $0x28] sm:$0xff]  ;;  %v433_v18 = vld [vmem:[#allocation2 + $0x30] sm:$0xff]  ;;  %s302_s21 = scalar_lea.vmem [#allocation7], %s757_s13 }
  0x54   : > { %s759_s18 = sshll.u32 %s1456_s16, 3  ;;  %914 = vmatpush3.bf16.msra.mxu0 %v911_v3  ;;  %v927_v16 = vpack.c.bf16 %v432_v14, %v431_v13  ;;  %v434_v19 = vld [vmem:[#allocation2 + $0x38] sm:$0xff]  ;;  %v435_v22 = vld [vmem:[#allocation2 + $0x40] sm:$0xff]  ;;  %v436_v23 = vld [vmem:[#allocation2 + $0x48] sm:$0xff]  ;;  %s665_s22 = sshll.u32 %s302_s21, 4  ;;  %s1379_s22 = int_to_ptr.vmem [resolvable:$true] %s665_s22 }
  0x55   : > { %s1346_s17 = scalar_lea.vmem %s1427_s0, %s759_s18  ;;  %916 = vmatprep.subr.bf16.mxu0 %v915_v6  ;;  %920 = vmatprep.subr.bf16.mxu1 %v919_v11  ;;  %v931_v21 = vpack.c.bf16 %v434_v19, %v433_v18  ;;  %v935_v24 = vpack.c.bf16 %v436_v23, %v435_v22  ;;  %v437_v25 = vld [vmem:[#allocation2 + $0x50] sm:$0xff]  ;;  %v438_v26 = vld [vmem:[#allocation2 + $0x58] sm:$0xff]  ;;  %v439_v28 = vld [vmem:[#allocation2 + $0x60] sm:$0xff]  ;;  %s1384_s9 = scalar_lea.hbm %s1434_s7, %s772_s23 }
  0x56   : > { %v310_v5 = vld [vmem:[%s1346_s17] sm:$0xff]  ;;  %922 = vmatpush3.bf16.msra.mxu1 %v919_v11  ;;  %v311_v15 = vld [vmem:[%s1346_s17 + $0x8] sm:$0xff]  ;;  %v312_v17 = vld [vmem:[%s1346_s17 + $0x10] sm:$0xff]  ;;  %v939_v27 = vpack.c.bf16 %v438_v26, %v437_v25  ;;  %s1386_s15 = scalar_lea.sflag [#allocation4], %s300_s14  ;;  %s1103_s28 = scalar_lea.vmem %s1379_s22, 512 }
  0x57   : > { %829 = vmatprep.mubr.msk.f32.mxu0 %vm325_vm0, %v310_v5  ;;  %924 = vmatprep.subr.bf16.mxu1 %v923_v12  ;;  %v313_v20 = vld [vmem:[%s1346_s17 + $0x18] sm:$0xff]  ;;  %v440_v29 = vld [vmem:[#allocation2 + $0x68] sm:$0xff]  ;;  %v441_v31 = vld [vmem:[#allocation2 + $0x70] sm:$0xff]  ;;  %p1104_p12 = scmp.ne.s32.totalorder %s1379_s22, %s1103_s28  ;;  %p1448_p1 = scmp.ne.s32.totalorder %s1439_s11, 0 }
  0x58   : > { %918 = vmatpush3.bf16.msra.mxu0 %v915_v6  ;;  %v943_v30 = vpack.c.bf16 %v440_v29, %v439_v28  ;;  %v442_v32 = vld [vmem:[#allocation2 + $0x78] sm:$0xff]  ;;  %v539_v34 = vld [vmem:[#allocation5] sm:$0xff]  ;;  %v540_v35 = vld [vmem:[#allocation5 + $0x8] sm:$0xff]  ;;  %s1179_s10 = smov [#allocation7]  }
  0x59   : > { %v947_v33 = vpack.c.bf16 %v442_v32, %v441_v31  ;;  %v541_v36 = vld [vmem:[#allocation5 + $0x10] sm:$0xff]  ;;  %v951_v37 = vpack.c.bf16 %v540_v35, %v539_v34  ;;  %v542_v38 = vld [vmem:[#allocation5 + $0x18] sm:$0xff]  ;;  %v543_v40 = vld [vmem:[#allocation5 + $0x20] sm:$0xff]  ;;  %p1105_p2 = pnand %p1104_p12, %p1448_p1  ;;  %s1107_s19 = sshll.u32 %s1179_s10, 4  ;;  %s1108_s19 = int_to_ptr.vmem [resolvable:$false] %s1107_s19 }
  0x5a   : > { %926 = vmatpush3.bf16.msra.mxu1 %v923_v12  ;;  %v955_v39 = vpack.c.bf16 %v542_v38, %v541_v36  ;;  %v544_v41 = vld [vmem:[#allocation5 + $0x28] sm:$0xff]  ;;  %v545_v43 = vld [vmem:[#allocation5 + $0x30] sm:$0xff]  ;;  %v546_v44 = vld [vmem:[#allocation5 + $0x38] sm:$0xff]  ;;  %s1109_s16 = scalar_lea.vmem %s1108_s19, 1024  ;;  %p1110_p4 = scmp.lt.s32.totalorder %s1379_s22, %s1108_s19 }
  0x5b   : > { %830 = vmatmul.mubr.msk.f32.vlgmr.msra.gmra.mrb[0].mxu0 %vm325_vm0, %v311_v15  ;;  %928 = vmatprep.subr.bf16.mxu1 %v927_v16  ;;  %v959_v42 = vpack.c.bf16 %v544_v41, %v543_v40  ;;  %v963_v45 = vpack.c.bf16 %v546_v44, %v545_v43  ;;  %v547_v46 = vld [vmem:[#allocation5 + $0x40] sm:$0xff]  ;;  %v548_v47 = vld [vmem:[#allocation5 + $0x48] sm:$0xff]  ;;  %v549_v49 = vld [vmem:[#allocation5 + $0x50] sm:$0xff]  ;;  %p1106_p3 = pneg %p1105_p2  ;;  %p1111_p7 = scmp.lt.s32.totalorder %s1109_s16, %s1103_s28 }
  0x5c   : > { %832 = vmatprep.mubr.msk.f32.mxu0 %vm325_vm0, %v312_v17  ;;  %952 = vmatprep.subr.bf16.mxu0 %v951_v37  ;;  %v967_v48 = vpack.c.bf16 %v548_v47, %v547_v46  ;;  %v550_v50 = vld [vmem:[#allocation5 + $0x58] sm:$0xff]  ;;  %v551_v52 = vld [vmem:[#allocation5 + $0x60] sm:$0xff]  ;;  %v552_v53 = vld [vmem:[#allocation5 + $0x68] sm:$0xff] }
  0x5d   : > { %954 = vmatpush3.bf16.msra.mxu0 %v951_v37  ;;  %v971_v51 = vpack.c.bf16 %v550_v50, %v549_v49  ;;  %v975_v54 = vpack.c.bf16 %v552_v53, %v551_v52  ;;  %v760_v55 = vld [vmem:[%s1429_s2] ss:$0 sm:$0xff]  ;;  %v553_v4 = vld [vmem:[#allocation5 + $0x70] sm:$0xff]  ;;  %v554_v5 = vld [vmem:[#allocation5 + $0x78] sm:$0xff]  ;;  %p1112_p8 = por %p1111_p7, %p1110_p4 }
  0x5e   : > { %930 = vmatpush3.bf16.msra.mxu1 %v927_v16  ;;  %956 = vmatprep.subr.bf16.mxu0 %v955_v39  ;;  %v979_v6 = vpack.c.bf16 %v554_v5, %v553_v4  ;;  %v765_v7 = vld [vmem:[%s1431_s4] ss:$0 sm:$0xff] }
  0x5f   : > { %833 = vmatmul.mubr.msk.f32.gmra.mrb[2].mxu0 %vm325_vm0, %v313_v20  ;;  %932 = vmatprep.subr.bf16.mxu1 %v931_v21  ;;  %v766_v20 = vld [vmem:[%s1433_s6] ss:$0 sm:$0xff]  ;;  %p1113_p11 = pnand %p1112_p8, %p1106_p3 }
  0x61   : > { %958 = vmatpush3.bf16.msra.mxu0 %v955_v39 }
  0x62   : > { %934 = vmatpush3.bf16.msra.mxu1 %v931_v21  ;;  %960 = vmatprep.subr.bf16.mxu0 %v959_v42 }
  0x63   : > { %936 = vmatprep.subr.bf16.mxu1 %v935_v24 }
  0x65   : > { %962 = vmatpush3.bf16.msra.mxu0 %v959_v42 }
  0x66   : > { %938 = vmatpush3.bf16.msra.mxu1 %v935_v24  ;;  %964 = vmatprep.subr.bf16.mxu0 %v963_v45 }
  0x67   : > { %940 = vmatprep.subr.bf16.mxu1 %v939_v27 }
  0x69   : > { %966 = vmatpush3.bf16.msra.mxu0 %v963_v45 }
  0x6a   : > { %942 = vmatpush3.bf16.msra.mxu1 %v939_v27  ;;  %968 = vmatprep.subr.bf16.mxu0 %v967_v48 }
  0x6b   : > { %944 = vmatprep.subr.bf16.mxu1 %v943_v30 }
  0x6d   : > { %970 = vmatpush3.bf16.msra.mxu0 %v967_v48 }
  0x6e   : > { %946 = vmatpush3.bf16.msra.mxu1 %v943_v30  ;;  %972 = vmatprep.subr.bf16.mxu0 %v971_v51 }
  0x6f   : > { %948 = vmatprep.subr.bf16.mxu1 %v947_v33 }
  0x71   : > { %974 = vmatpush3.bf16.msra.mxu0 %v971_v51 }
  0x72   : > { %950 = vmatpush3.bf16.msra.mxu1 %v947_v33  ;;  %976 = vmatprep.subr.bf16.mxu0 %v975_v54 }
  0x75   : > { %978 = vmatpush3.bf16.msra.mxu0 %v975_v54 }
  0x76   : > { %980 = vmatprep.subr.bf16.mxu0 %v979_v6 }
  0x79   : > { %982 = vmatpush3.bf16.msra.mxu0 %v979_v6 }
 0x12e   : > { %v831_v56 = vpop.f32.mrb[0].mxu0 }
 0x12f   : > { %v410_v57 = vadd.f32 %v831_v56, %v760_v55  ;;  %v404_v58 = vpop.f32.mrb[1].mxu0 }
 0x130   : > { %v405_v59 = vadd.f32 %v760_v55, %v404_v58 }
 0x131   : > { %v424_v62 = vmax.f32 %v410_v57, 0.0 }
 0x132   : > { %v834_v60 = vpop.f32.mrb[2].mxu0  ;;  %v423_v61 = vmax.f32 %v405_v59, 0.0 }
 0x133   : > { %v420_v63 = vadd.f32 %v834_v60, %v760_v55  ;;  %v414_v0 = vpop.f32.mrb[3].mxu0 }
 0x134   : > { %v415_v1 = vadd.f32 %v760_v55, %v414_v0  ;;  %867 = vmatprep.mubr.f32.mxu1 %v423_v61 }
 0x135   : > { %868 = vmatmul.mubr.f32.vlgmr.msra.gmra.mrb[0].mxu1 %v424_v62  ;;  %v426_v3 = vmax.f32 %v420_v63, 0.0 }
 0x136   : > { %v425_v2 = vmax.f32 %v415_v1, 0.0 }
 0x138   : > { %870 = vmatprep.mubr.f32.mxu1 %v425_v2 }
 0x139   : > { %871 = vmatmul.mubr.f32.gmra.mrb[2].mxu1 %v426_v3 }
 0x208   : > { %v869_v8 = vpop.f32.mrb[0].mxu1 }
 0x209   : > { %v522_v9 = vadd.f32 %v869_v8, %v765_v7  ;;  %v516_v10 = vpop.f32.mrb[1].mxu1 }
 0x20a   : > { %v517_v11 = vadd.f32 %v765_v7, %v516_v10 }
 0x20b   : > { %v536_v14 = vmax.f32 %v522_v9, 0.0 }
 0x20c   : > { %v535_v12 = vmax.f32 %v517_v11, 0.0  ;;  %v872_v13 = vpop.f32.mrb[2].mxu1 }
 0x20d   : > { %v532_v15 = vadd.f32 %v872_v13, %v765_v7  ;;  %v526_v16 = vpop.f32.mrb[3].mxu1 }
 0x20e   : > { %v527_v17 = vadd.f32 %v765_v7, %v526_v16  ;;  %905 = vmatprep.mubr.f32.mxu0 %v535_v12 }
 0x20f   : > { %906 = vmatmul.mubr.f32.vlgmr.msra.gmra.mrb[4].mxu0 %v536_v14  ;;  %v538_v19 = vmax.f32 %v532_v15, 0.0 }
 0x210   : > { %v537_v18 = vmax.f32 %v527_v17, 0.0 }
 0x212   : > { %908 = vmatprep.mubr.f32.mxu0 %v537_v18 }
 0x213   : > { %909 = vmatmul.mubr.f32.gmra.mrb[6].mxu0 %v538_v19 }
 0x2e2   : > { %v907_v21 = vpop.f32.mrb[4].mxu0 }
 0x2e3   : > { %v634_v22 = vadd.f32 %v907_v21, %v766_v20  ;;  %v628_v23 = vpop.f32.mrb[5].mxu0 }
 0x2e4   : > { %v629_v24 = vadd.f32 %v766_v20, %v628_v23 }
 0x2e5   : > { %648 = vst [vmem:[%s302_s21 + $0x8] sm:$0xff] %v634_v22 }
 0x2e6   : > { %647 = vst [vmem:[%s302_s21] sm:$0xff] %v629_v24  ;;  %v910_v25 = vpop.f32.mrb[6].mxu0 }
 0x2e7   : > { %v644_v26 = vadd.f32 %v910_v25, %v766_v20  ;;  %v638_v27 = vpop.f32.mrb[7].mxu0 }
 0x2e8   : > { %v639_v28 = vadd.f32 %v766_v20, %v638_v27 }
 0x2e9   : > { %650 = vst [vmem:[%s302_s21 + $0x18] sm:$0xff] %v644_v26 }
 0x2ea   : > { %649 = vst [vmem:[%s302_s21 + $0x10] sm:$0xff] %v639_v28 }
 0x2eb   : > { %1116 = shalt.err (!%p1113_p11)
}
 0x2ec   : > { %s1117_s18 = scalar_lea.hbm %s1384_s9, 512  ;;  %s1121_s17 = scalar_lea.hbm %s1434_s7, 1024 }
 0x2ed   : > { %p1118_p13 = scmp.ne.s32.totalorder %s1384_s9, %s1117_s18  ;;  %p1122_p6 = scmp.lt.u32.totalorder %s1384_s9, %s1434_s7 }
 0x2ee   : > { %p1123_p9 = scmp.lt.u32.totalorder %s1121_s17, %s1117_s18  ;;  %p1125_p12 = scmp.lt.u32.totalorder %s1117_s18, %s1384_s9 }
 0x2ef   : > { %p1119_p5 = pnand %p1118_p13, %p1448_p1 }
 0x2f0   : > { %p1124_p10 = por %p1123_p9, %p1122_p6 }
 0x2f1   : > { %p1120_p0 = pneg %p1119_p5 }
 0x2f2   : > { %p1126_p2 = por %p1125_p12, %p1124_p10 }
 0x2f4   : > { %p1127_p3 = pnand %p1126_p2, %p1120_p0 }
 0x2f6   : > { %1130 = shalt.err (!%p1127_p3)
}
 0x2f7   : > { %s1180_s23 = smov 128   ;;  %s1181_s29 = smov 8  }
 0x2f8   : > { %991 = dma.vmem_to_hbm [thread:$0]  (%p1448_p1), %s1379_s22, 512, %s1384_s9, %s1386_s15, %s1180_s23, %s1180_s23, %s1181_s29  }
 0x2f9 PF: > { %p1008_p4 = scmp.ge.s32.totalorder %s1173_s27, 2  ;;  %s680_s8 = sand.u32 1, %s1161_s24  }
 0x2fa   : > { %p1449_p7 = scmp.ne.s32.totalorder %s1440_s12, 0  ;;  %s681_s28 = scalar_lea.sflag [#allocation4], %s680_s8 }
 0x2fc   : > { %p1001_p8 = pnand %p1008_p4, %p1449_p7 }
 0x2fe   : > { %1156 = dma.done.wait (!%p1001_p8), %s681_s28, 512  }
 0x2ff   : > { %1158 = vsyncadd (!%p1001_p8), %s681_s28, 4294966784  ;;  %s1450_s10 = sld [smem:[#allocation11_spill]]  ;;  %p19_p11 = scmp.ge.s32.totalorder %s1247_s30, 4  }
 0x300   : > { %s1451_s24 = smov %s1165_s25  ;;  %s1452_s25 = smov %s1169_s26 }
 0x301   : > { %s1454_s27 = smov %s1247_s30  ;;  %21 = sbr.rel (!%p19_p11) target bundleno = 5 (0x5), region = 92 }
 0x305   : > { %s1453_s26 = smov %s1450_s10 }
 0x308   :  { %686 = vsyncpa [#allocation3], 1 }
 0x309   :  { %688 = vsyncpa [#allocation3 + $0x1], 1 }
 0x30a   :  { %689 = vsyncpa [#allocation6], 1 }
 0x30b   :  { %690 = vsyncpa [#allocation4], 1 }
 0x30c   :  { %692 = vsyncpa [#allocation4 + $0x1], 1 }

</bundles_post_ra>
